<compile_context>
chip_gen: v7x
topology: tpu7x:2x2x1
jax: 0.10.0
libtpu: 0.0.40
codegen_flags: <defaults>
</compile_context>

<pallas_src>
import jax
import jax.numpy as jnp
from jax.experimental import pallas as pl
from jax.experimental.pallas import tpu as pltpu

BN_EPS = 1e-5
LANE = 128          # lane width / f32 tile minor dim
MXU_ALIGN = 256     # v6e/v7x MXU M-dim; also a multiple of 128 (v5e) and 16 (bf16 sublane)
TARGET_TILE_B = 1024  # ~85%+ of HBM roofline in measured tile sweeps


def _round_up(n, m):
    return (n + m - 1) // m * m


def _pad2(a, rows, cols):
    return jnp.pad(a, ((0, rows - a.shape[0]), (0, cols - a.shape[1])))


def _mlp_kernel(x_ref, w1_ref, b1_ref, w2_ref, b2_ref, wo_ref, bo_ref, out_ref):
    """Fused forward for one batch tile:
         h1 = relu(x @ W1 + b1)
         h2 = relu(h1 @ W2' + b2')     # BN1 folded into W2'/b2'
         y  = h2 @ Wo' + bo'           # BN2 folded into Wo'/bo'
       Matmul inputs bf16 (cast in-kernel), accumulation + elementwise in f32.
       Dropout = identity (eval mode)."""
    x = x_ref[...].astype(w1_ref.dtype)            # f32 -> bf16 cast, free VPU filler
    h = jnp.dot(x, w1_ref[...], preferred_element_type=jnp.float32) + b1_ref[...]
    h = jnp.maximum(h, 0.0)
    h = jnp.dot(h.astype(w2_ref.dtype), w2_ref[...],
                preferred_element_type=jnp.float32) + b2_ref[...]
    h = jnp.maximum(h, 0.0)
    out = jnp.dot(h.astype(wo_ref.dtype), wo_ref[...],
                  preferred_element_type=jnp.float32) + bo_ref[...]
    out_ref[...] = out.astype(out_ref.dtype)


def prepare_params(params, compute_dtype=jnp.bfloat16):
    """One-time prep: fold eval-mode BN into the next Linear, pad only the HIDDEN dims
    to lane-dense multiples of 128 (input/output feature widths stay exact), cast matmul
    weights to bf16 (biases stay f32)."""
    (w1, b1, g1, be1, rm1, rv1,
     w2, b2, g2, be2, rm2, rv2,
     wo, bo) = params

    # Eval-mode BN as a per-feature affine y*scale + shift.
    s1 = g1 * jax.lax.rsqrt(rv1 + BN_EPS)
    t1 = be1 - rm1 * s1
    s2 = g2 * jax.lax.rsqrt(rv2 + BN_EPS)
    t2 = be2 - rm2 * s2

    # Fold BN (which follows ReLU) into the *next* Linear -- exact.
    w2f = s1.reshape(-1, 1) * w2
    b2f = b2 + t1 @ w2
    wof = s2.reshape(-1, 1) * wo
    bof = bo + t2 @ wo

    d_in, h1 = w1.shape
    h2 = w2.shape[1]
    d_out = wo.shape[1]
    h1_p, h2_p = _round_up(h1, LANE), _round_up(h2, LANE)

    # Padding of hidden units is exact: padded units get bias 0 -> relu(0)=0 and hit
    # zero-weight rows downstream.  d_in / d_out are deliberately NOT padded.
    w1p = _pad2(w1, d_in, h1_p).astype(compute_dtype)
    b1p = _pad2(b1, 1, h1_p)
    w2p = _pad2(w2f, h1_p, h2_p).astype(compute_dtype)
    b2p = _pad2(b2f, 1, h2_p)
    wop = _pad2(wof, h2_p, d_out).astype(compute_dtype)
    bop = bof                                   # (1, d_out) f32, unpadded
    return (w1p, b1p, w2p, b2p, wop, bop)


def _pick_tile_b(B):
    """Largest MXU-aligned batch tile with padding waste <= one tile; >=2 grid steps
    when the batch is big enough (so v7x uses both TensorCores)."""
    n_tiles = max(1, pl.cdiv(B, TARGET_TILE_B))
    if B >= 2 * MXU_ALIGN:
        n_tiles = max(n_tiles, 2)
    return _round_up(pl.cdiv(B, n_tiles), MXU_ALIGN)


def improved_mlp_forward(x, prepared, *, tile_b=None):
    """Runs the fused, batch-tiled Pallas kernel. x: (B, input_dim) float32.
    Returns (B, output_dim) float32."""
    w1p, b1p, w2p, b2p, wop, bop = prepared
    B, d_in = x.shape
    assert d_in == w1p.shape[0], "input feature dim mismatch with prepared params"
    h1_p = w1p.shape[1]
    h2_p = w2p.shape[1]
    d_out = wop.shape[1]

    if tile_b is None:
        tile_b = _pick_tile_b(B)
    tile_b = max(16, _round_up(tile_b, 16))        # bf16 sublane floor, never 8-row tiles
    tile_b = min(tile_b, _round_up(B, 16))         # never exceed the (sublane-padded) batch
    b_pad = _round_up(B, tile_b)

    # Only pad batch ROWS when needed (keeps f32 and the true feature width; the common
    # divisible case streams x straight from its original HBM buffer -- no extra copy).
    xs = x if b_pad == B else jnp.pad(x, ((0, b_pad - B), (0, 0)))

    grid = (b_pad // tile_b,)

    def resident(shape):
        # Constant index_map -> DMA'd once, VMEM-resident across all grid steps.
        return pl.BlockSpec(shape, lambda i: (0, 0))

    # Explicit scoped-VMEM budget: resident weights (double-buffered by default) +
    # streamed activation tiles + f32 intermediates + slack.  Raises v5e's 16 MiB
    # default; capped well under v7x's 64 MiB physical VMEM.
    resident_bytes = sum(int(a.size) * a.dtype.itemsize
                         for a in (w1p, b1p, w2p, b2p, wop, bop))
    stream_bytes = tile_b * (d_in + d_out) * 4
    work_bytes = tile_b * (h1_p + h2_p) * 4
    vmem_limit = int(min(max(2 * (resident_bytes + stream_bytes) + work_bytes + (8 << 20),
                             32 << 20),
                         48 << 20))

    cost = pl.CostEstimate(
        flops=2 * b_pad * (d_in * h1_p + h1_p * h2_p + h2_p * d_out),
        transcendentals=0,
        bytes_accessed=int(b_pad * (d_in + d_out) * 4 + resident_bytes),
    )

    out = pl.pallas_call(
        _mlp_kernel,
        out_shape=jax.ShapeDtypeStruct((b_pad, d_out), jnp.float32),
        grid=grid,
        in_specs=[
            # x streams per batch tile with its TRUE feature width (full-extent last dim).
            pl.BlockSpec((tile_b, d_in), lambda i: (i, 0)),
            resident(w1p.shape), resident(b1p.shape),
            resident(w2p.shape), resident(b2p.shape),
            resident(wop.shape), resident(bop.shape),
        ],
        # Output written with its TRUE width (lane-masked store beats 16x padded bytes).
        out_specs=pl.BlockSpec((tile_b, d_out), lambda i: (i, 0)),
        compiler_params=pltpu.CompilerParams(
            # Independent batch tiles -> shard across the 2 TensorCores on v7x;
            # harmless no-op on single-TC v5e/v6e.
            dimension_semantics=("parallel",),
            vmem_limit_bytes=vmem_limit,
        ),
        cost_estimate=cost,
    )(xs, w1p, b1p, w2p, b2p, wop, bop)

    return out if b_pad == B else out[:B]


def init_params(key, input_dim, hidden_dims, output_dim):
    """Deterministic PyTorch-style init. Weights returned pre-transposed (in, out)."""
    params = []
    prev_dim = input_dim
    for h in hidden_dims:
        key, kw, kb = jax.random.split(key, 3)
        bound = 1.0 / jnp.sqrt(prev_dim)
        w = jax.random.uniform(kw, (prev_dim, h), jnp.float32, -bound, bound)
        b = jax.random.uniform(kb, (1, h), jnp.float32, -bound, bound)
        gamma = jnp.ones((1, h), jnp.float32)
        beta = jnp.zeros((1, h), jnp.float32)
        rmean = jnp.zeros((1, h), jnp.float32)
        rvar = jnp.ones((1, h), jnp.float32)
        params += [w, b, gamma, beta, rmean, rvar]
        prev_dim = h
    key, kw, kb = jax.random.split(key, 3)
    bound = 1.0 / jnp.sqrt(prev_dim)
    wo = jax.random.uniform(kw, (prev_dim, output_dim), jnp.float32, -bound, bound)
    bo = jax.random.uniform(kb, (1, output_dim), jnp.float32, -bound, bound)
    params += [wo, bo]
    return tuple(params)


def reference_forward(x, params):
    """Plain-JAX f32 reference mirroring the PyTorch eval-mode forward."""
    (w1, b1, g1, be1, rm1, rv1,
     w2, b2, g2, be2, rm2, rv2,
     wo, bo) = params

    def block(h, w, b, g, be, rm, rv):
        y = h @ w + b
        y = jnp.maximum(y, 0.0)
        return (y - rm) / jnp.sqrt(rv + BN_EPS) * g + be

    h = block(x, w1, b1, g1, be1, rm1, rv1)
    h = block(h, w2, b2, g2, be2, rm2, rv2)
    return h @ wo + bo


def matched_reference(x, prepared):
    """Plain-JAX reference using the exact same folded/padded/bf16 params as the kernel."""
    w1p, b1p, w2p, b2p, wop, bop = prepared
    xb = x.astype(w1p.dtype)
    h = jnp.maximum(jnp.dot(xb, w1p, preferred_element_type=jnp.float32) + b1p, 0.0)
    h = jnp.maximum(jnp.dot(h.astype(w2p.dtype), w2p,
                            preferred_element_type=jnp.float32) + b2p, 0.0)
    return jnp.dot(h.astype(wop.dtype), wop, preferred_element_type=jnp.float32) + bop


if __name__ == "__main__":
    # Small shapes consistent with the module structure.
    input_dim = 16
    hidden_dims = [32, 32]
    output_dim = 8

    key = jax.random.PRNGKey(0)
    key, kp = jax.random.split(key)
    params = init_params(kp, input_dim, hidden_dims, output_dim)
    prepared = prepare_params(params)

    # (batch, explicit tile_b or None) -- exercises single-tile, multi-step streaming,
    # and the ragged-batch (row-pad) paths.
    cases = [(32, None), (384, 128), (50, None)]
    for batch, tb in cases:
        kx = jax.random.fold_in(key, batch)
        x = jax.random.normal(kx, (batch, input_dim), jnp.float32)

        out = improved_mlp_forward(x, prepared, tile_b=tb)
        out = jax.block_until_ready(out)
        assert out.shape == (batch, output_dim)

        # Tight check against a plain-JAX model using identical folded/bf16 params.
        ref_m = matched_reference(x, prepared)
        assert jnp.allclose(out, ref_m, atol=1e-3, rtol=1e-3), \
            f"mismatch vs matched reference (B={batch})"

        # Semantics check against the f32 PyTorch eval-mode reference
        # (looser tolerance because the kernel feeds bf16 into the MXU).
        ref_f32 = reference_forward(x, params)
        assert jnp.allclose(out, ref_f32, atol=5e-2, rtol=5e-2), \
            f"mismatch vs f32 reference (B={batch})"

    print("KERNEL_OK")
</pallas_src>

<mosaic_0001>
module attributes {stable_mosaic.version = 11 : i64} {
  func.func @_mlp_kernel(%arg0: i32, %arg1: memref<32x16xf32, #tpu.memory_space<vmem>>, %arg2: memref<16x128xbf16, #tpu.memory_space<vmem>>, %arg3: memref<1x128xf32, #tpu.memory_space<vmem>>, %arg4: memref<128x128xbf16, #tpu.memory_space<vmem>>, %arg5: memref<1x128xf32, #tpu.memory_space<vmem>>, %arg6: memref<128x8xbf16, #tpu.memory_space<vmem>>, %arg7: memref<1x8xf32, #tpu.memory_space<vmem>>, %arg8: memref<32x8xf32, #tpu.memory_space<vmem>>) attributes {dimension_semantics = [#tpu.dimension_semantics<parallel>], iteration_bounds = array<i64: 1>, scalar_prefetch = 0 : i64, scratch_operands = 0 : i64, tpu.core_type = #tpu.core_type<tc>, window_params = [{transform_indices = @transform_0, window_bounds = array<i64: 32, 16>}, {pipeline_mode = #tpu.pipeline_mode<synchronous>, transform_indices = @transform_1, window_bounds = array<i64: 16, 128>}, {pipeline_mode = #tpu.pipeline_mode<synchronous>, transform_indices = @transform_2, window_bounds = array<i64: 1, 128>}, {pipeline_mode = #tpu.pipeline_mode<synchronous>, transform_indices = @transform_3, window_bounds = array<i64: 128, 128>}, {pipeline_mode = #tpu.pipeline_mode<synchronous>, transform_indices = @transform_4, window_bounds = array<i64: 1, 128>}, {pipeline_mode = #tpu.pipeline_mode<synchronous>, transform_indices = @transform_5, window_bounds = array<i64: 128, 8>}, {pipeline_mode = #tpu.pipeline_mode<synchronous>, transform_indices = @transform_6, window_bounds = array<i64: 1, 8>}, {transform_indices = @transform_7, window_bounds = array<i64: 32, 8>}]} {
    %c0 = arith.constant 0 : index
    %c0_0 = arith.constant 0 : index
    %0 = vector.load %arg1[%c0, %c0_0] : memref<32x16xf32, #tpu.memory_space<vmem>>, vector<32x16xf32>
    %1 = arith.truncf %0 : vector<32x16xf32> to vector<32x16xbf16>
    %c0_1 = arith.constant 0 : index
    %c0_2 = arith.constant 0 : index
    %2 = vector.load %arg2[%c0_1, %c0_2] : memref<16x128xbf16, #tpu.memory_space<vmem>>, vector<16x128xbf16>
    %cst = arith.constant dense<0.000000e+00> : vector<32x128xf32>
    %3 = tpu.matmul %1, %2, %cst {dimension_numbers = #tpu.dot_dimension_numbers<[1], [0], [0], [1], [0, 0, 1, 1], [], []>} : vector<32x16xbf16>, vector<16x128xbf16>, vector<32x128xf32> -> vector<32x128xf32>
    %c0_3 = arith.constant 0 : index
    %c0_4 = arith.constant 0 : index
    %4 = vector.load %arg3[%c0_3, %c0_4] : memref<1x128xf32, #tpu.memory_space<vmem>>, vector<1x128xf32>
    %5 = vector.broadcast %4 : vector<1x128xf32> to vector<32x128xf32>
    %6 = arith.addf %3, %5 : vector<32x128xf32>
    %cst_5 = arith.constant 0.000000e+00 : f32
    %7 = vector.broadcast %cst_5 : f32 to vector<32x128xf32>
    %8 = arith.maximumf %6, %7 : vector<32x128xf32>
    %9 = arith.truncf %8 : vector<32x128xf32> to vector<32x128xbf16>
    %c0_6 = arith.constant 0 : index
    %c0_7 = arith.constant 0 : index
    %10 = vector.load %arg4[%c0_6, %c0_7] : memref<128x128xbf16, #tpu.memory_space<vmem>>, vector<128x128xbf16>
    %cst_8 = arith.constant dense<0.000000e+00> : vector<32x128xf32>
    %11 = tpu.matmul %9, %10, %cst_8 {dimension_numbers = #tpu.dot_dimension_numbers<[1], [0], [0], [1], [0, 0, 1, 1], [], []>} : vector<32x128xbf16>, vector<128x128xbf16>, vector<32x128xf32> -> vector<32x128xf32>
    %c0_9 = arith.constant 0 : index
    %c0_10 = arith.constant 0 : index
    %12 = vector.load %arg5[%c0_9, %c0_10] : memref<1x128xf32, #tpu.memory_space<vmem>>, vector<1x128xf32>
    %13 = vector.broadcast %12 : vector<1x128xf32> to vector<32x128xf32>
    %14 = arith.addf %11, %13 : vector<32x128xf32>
    %cst_11 = arith.constant 0.000000e+00 : f32
    %15 = vector.broadcast %cst_11 : f32 to vector<32x128xf32>
    %16 = arith.maximumf %14, %15 : vector<32x128xf32>
    %17 = arith.truncf %16 : vector<32x128xf32> to vector<32x128xbf16>
    %c0_12 = arith.constant 0 : index
    %c0_13 = arith.constant 0 : index
    %18 = vector.load %arg6[%c0_12, %c0_13] : memref<128x8xbf16, #tpu.memory_space<vmem>>, vector<128x8xbf16>
    %cst_14 = arith.constant dense<0.000000e+00> : vector<32x8xf32>
    %19 = tpu.matmul %17, %18, %cst_14 {dimension_numbers = #tpu.dot_dimension_numbers<[1], [0], [0], [1], [0, 0, 1, 1], [], []>} : vector<32x128xbf16>, vector<128x8xbf16>, vector<32x8xf32> -> vector<32x8xf32>
    %c0_15 = arith.constant 0 : index
    %c0_16 = arith.constant 0 : index
    %20 = vector.load %arg7[%c0_15, %c0_16] : memref<1x8xf32, #tpu.memory_space<vmem>>, vector<1x8xf32>
    %21 = vector.broadcast %20 : vector<1x8xf32> to vector<32x8xf32>
    %22 = arith.addf %19, %21 : vector<32x8xf32>
    %c0_17 = arith.constant 0 : index
    %c0_18 = arith.constant 0 : index
    %23 = vector.load %arg8[%c0_17, %c0_18] : memref<32x8xf32, #tpu.memory_space<vmem>>, vector<32x8xf32>
    tpu.vector_store %arg8[%c0_17, %c0_18], %22 {strides = array<i32>} : memref<32x8xf32, #tpu.memory_space<vmem>>, vector<32x8xf32>,
    return
  }
  func.func @transform_0(%arg0: i32) -> (i32, i32) {
    %c0_i32 = arith.constant 0 : i32
    %c0_i32_0 = arith.constant 0 : i32
    return %arg0, %c0_i32 : i32, i32
  }
  func.func @transform_1(%arg0: i32) -> (i32, i32) {
    %c0_i32 = arith.constant 0 : i32
    %c0_i32_0 = arith.constant 0 : i32
    %c0_i32_1 = arith.constant 0 : i32
    return %c0_i32, %c0_i32_0 : i32, i32
  }
  func.func @transform_2(%arg0: i32) -> (i32, i32) {
    %c0_i32 = arith.constant 0 : i32
    %c0_i32_0 = arith.constant 0 : i32
    %c0_i32_1 = arith.constant 0 : i32
    return %c0_i32, %c0_i32_0 : i32, i32
  }
  func.func @transform_3(%arg0: i32) -> (i32, i32) {
    %c0_i32 = arith.constant 0 : i32
    %c0_i32_0 = arith.constant 0 : i32
    %c0_i32_1 = arith.constant 0 : i32
    return %c0_i32, %c0_i32_0 : i32, i32
  }
  func.func @transform_4(%arg0: i32) -> (i32, i32) {
    %c0_i32 = arith.constant 0 : i32
    %c0_i32_0 = arith.constant 0 : i32
    %c0_i32_1 = arith.constant 0 : i32
    return %c0_i32, %c0_i32_0 : i32, i32
  }
  func.func @transform_5(%arg0: i32) -> (i32, i32) {
    %c0_i32 = arith.constant 0 : i32
    %c0_i32_0 = arith.constant 0 : i32
    %c0_i32_1 = arith.constant 0 : i32
    return %c0_i32, %c0_i32_0 : i32, i32
  }
  func.func @transform_6(%arg0: i32) -> (i32, i32) {
    %c0_i32 = arith.constant 0 : i32
    %c0_i32_0 = arith.constant 0 : i32
    %c0_i32_1 = arith.constant 0 : i32
    return %c0_i32, %c0_i32_0 : i32, i32
  }
  func.func @transform_7(%arg0: i32) -> (i32, i32) {
    %c0_i32 = arith.constant 0 : i32
    %c0_i32_0 = arith.constant 0 : i32
    return %arg0, %c0_i32 : i32, i32
  }
}

</mosaic_0001>

<bundles_post_ra>
// kernel: tpu_custom_call.1
= control target key start
LH: loop header
LB: loop body
LE: loop exit
PB: predicated region body
PF: predicated region fallthrough
CT: control target
= control target key end

     0   :  { %vm48_vm0 = vcmask 130048   ;;  %vm356_vm1 = vcmask 64512   ;;  %s597_s1 = inlined_call_operand.vmem [shape: bf16[16,128], index: 1, kind: input, shape index: {}]   ;;  %s598_s0 = inlined_call_operand.vmem [shape: f32[32,16], index: 0, kind: input, shape index: {}]   ;;  %s599_s3 = inlined_call_operand.vmem [shape: bf16[128,128], index: 3, kind: input, shape index: {}]   ;;  %s600_s5 = inlined_call_operand.vmem [shape: bf16[128,8], index: 5, kind: input, shape index: {}]   ;;  %s601_s2 = inlined_call_operand.vmem [shape: f32[1,128], index: 2, kind: input, shape index: {}]   ;;  %s602_s4 = inlined_call_operand.vmem [shape: f32[1,128], index: 4, kind: input, shape index: {}]   ;;  %s603_s6 = inlined_call_operand.vmem [shape: f32[1,8], index: 6, kind: input, shape index: {}]   ;;  %s604_s7 = inlined_call_operand.vmem [shape: f32[32,8], index: 7, kind: output, shape index: {}]  }
   0x1   :  { %v456_v0 = vld [vmem:[%s597_s1] sm:$0xff]   ;;  %v28_v2 = vld [vmem:[%s598_s0 + $0x8] sm:$0xff]  ;;  %v29_v3 = vld [vmem:[%s598_s0 + $0x10] sm:$0xff] }
   0x2   :  { %v27_v1 = vld [vmem:[%s598_s0] sm:$0xff]  ;;  %410 = vmatprep.subr.bf16.mxu0 %v456_v0  ;;  %v30_v5 = vld [vmem:[%s598_s0 + $0x18] sm:$0xff]  ;;  %v458_v8 = vld [vmem:[%s599_s3 + $0x8] sm:$0xff]  }
   0x3   :  { %v31_v4 = vpack.c.bf16 %v28_v2, %v27_v1  ;;  %411 = vmatpush3.bf16.msra.mxu0 %v456_v0  ;;  %v32_v6 = vpack.c.bf16 %v30_v5, %v29_v3  ;;  %v457_v7 = vld [vmem:[%s599_s3] sm:$0xff]   ;;  %v459_v9 = vld [vmem:[%s599_s3 + $0x10] sm:$0xff]   ;;  %v460_v10 = vld [vmem:[%s599_s3 + $0x18] sm:$0xff]  }
   0x4   :  { %416 = vmatprep.subr.bf16.mxu1 %v457_v7  ;;  %v461_v11 = vld [vmem:[%s599_s3 + $0x20] sm:$0xff]   ;;  %v462_v12 = vld [vmem:[%s599_s3 + $0x28] sm:$0xff]   ;;  %v463_v13 = vld [vmem:[%s599_s3 + $0x30] sm:$0xff]  }
   0x5   :  { %412 = vmatprep.mubr.msk.bf16.mxu0 %vm48_vm0, %v31_v4  ;;  %417 = vmatpush3.bf16.msra.mxu1 %v457_v7  ;;  %v464_v14 = vld [vmem:[%s599_s3 + $0x38] sm:$0xff]   ;;  %v465_v15 = vld [vmem:[%s600_s5] sm:$0xff]   ;;  %v466_v16 = vld [vmem:[%s600_s5 + $0x8] sm:$0xff]  }
   0x6   :  { %413 = vmatmul.mubr.msk.bf16.vlgmr.msra.gmra.mrb[0].mxu0 %vm48_vm0, %v32_v6  ;;  %418 = vmatprep.subr.bf16.mxu1 %v458_v8  ;;  %v467_v17 = vld [vmem:[%s600_s5 + $0x10] sm:$0xff]   ;;  %v468_v18 = vld [vmem:[%s600_s5 + $0x18] sm:$0xff]   ;;  %v469_v19 = vld [vmem:[%s600_s5 + $0x20] sm:$0xff]  }
   0x7   :  { %436 = vmatprep.subr.bf16.mxu0 %v465_v15  ;;  %v470_v20 = vld [vmem:[%s600_s5 + $0x28] sm:$0xff]   ;;  %v365_v21 = vld [vmem:[%s601_s2] ss:$0 sm:$0xff]  ;;  %v471_v36 = vld [vmem:[%s600_s5 + $0x30] sm:$0xff]  }
   0x8   :  { %437 = vmatpush3.bf16.msra.mxu0 %v465_v15  ;;  %v472_v37 = vld [vmem:[%s600_s5 + $0x38] sm:$0xff]   ;;  %v369_v38 = vld [vmem:[%s602_s4] ss:$0 sm:$0xff] }
   0x9   :  { %419 = vmatpush3.bf16.msra.mxu1 %v458_v8  ;;  %438 = vmatprep.subr.bf16.mxu0 %v466_v16  ;;  %v378_v53 = vld [vmem:[%s603_s6] ss:$0 sm:$0xff] }
   0xa   :  { %420 = vmatprep.subr.bf16.mxu1 %v459_v9 }
   0xc   :  { %439 = vmatpush3.bf16.msra.mxu0 %v466_v16 }
   0xd   :  { %421 = vmatpush3.bf16.msra.mxu1 %v459_v9  ;;  %440 = vmatprep.subr.bf16.mxu0 %v467_v17 }
   0xe   :  { %422 = vmatprep.subr.bf16.mxu1 %v460_v10 }
  0x10   :  { %441 = vmatpush3.bf16.msra.mxu0 %v467_v17 }
  0x11   :  { %423 = vmatpush3.bf16.msra.mxu1 %v460_v10  ;;  %442 = vmatprep.subr.bf16.mxu0 %v468_v18 }
  0x12   :  { %424 = vmatprep.subr.bf16.mxu1 %v461_v11 }
  0x14   :  { %443 = vmatpush3.bf16.msra.mxu0 %v468_v18 }
  0x15   :  { %425 = vmatpush3.bf16.msra.mxu1 %v461_v11  ;;  %444 = vmatprep.subr.bf16.mxu0 %v469_v19 }
  0x16   :  { %426 = vmatprep.subr.bf16.mxu1 %v462_v12 }
  0x18   :  { %445 = vmatpush3.bf16.msra.mxu0 %v469_v19 }
  0x19   :  { %427 = vmatpush3.bf16.msra.mxu1 %v462_v12  ;;  %446 = vmatprep.subr.bf16.mxu0 %v470_v20 }
  0x1a   :  { %428 = vmatprep.subr.bf16.mxu1 %v463_v13 }
  0x1c   :  { %447 = vmatpush3.bf16.msra.mxu0 %v470_v20 }
  0x1d   :  { %429 = vmatpush3.bf16.msra.mxu1 %v463_v13  ;;  %448 = vmatprep.subr.bf16.mxu0 %v471_v36 }
  0x1e   :  { %430 = vmatprep.subr.bf16.mxu1 %v464_v14 }
  0x20   :  { %449 = vmatpush3.bf16.msra.mxu0 %v471_v36 }
  0x21   :  { %431 = vmatpush3.bf16.msra.mxu1 %v464_v14  ;;  %450 = vmatprep.subr.bf16.mxu0 %v472_v37 }
  0x24   :  { %451 = vmatpush3.bf16.msra.mxu0 %v472_v37 }
  0xd9   :  { %v414_v22 = vpop.f32.mrb[0].mxu0 }
  0xda   :  { %v98_v23 = vadd.f32 %v414_v22, %v365_v21  ;;  %v89_v24 = vpop.f32.mrb[1].mxu0 }
  0xdb   :  { %v90_v25 = vadd.f32 %v365_v21, %v89_v24  ;;  %v415_v26 = vpop.f32.mrb[2].mxu0 }
  0xdc   :  { %v101_v27 = vadd.f32 %v415_v26, %v365_v21  ;;  %v92_v28 = vpop.f32.mrb[3].mxu0  ;;  %v106_v30 = vmax.f32 %v98_v23, 0.0 }
  0xdd   :  { %v93_v29 = vadd.f32 %v365_v21, %v92_v28  ;;  %v104_v32 = vmax.f32 %v90_v25, 0.0 }
  0xde   :  { %v107_v31 = vmax.f32 %v101_v27, 0.0 }
  0xdf   :  { %v105_v33 = vmax.f32 %v93_v29, 0.0 }
  0xe0   :  { %v109_v34 = vpack.c.bf16 %v107_v31, %v106_v30 }
  0xe1   :  { %v108_v35 = vpack.c.bf16 %v105_v33, %v104_v32 }
  0xe3   :  { %432 = vmatprep.mubr.bf16.mxu1 %v108_v35 }
  0xe4   :  { %433 = vmatmul.mubr.bf16.vlgmr.msra.gmra.mrb[0].mxu1 %v109_v34 }
 0x1b7   :  { %v434_v39 = vpop.f32.mrb[0].mxu1 }
 0x1b8   :  { %v224_v40 = vadd.f32 %v434_v39, %v369_v38  ;;  %v215_v41 = vpop.f32.mrb[1].mxu1 }
 0x1b9   :  { %v216_v42 = vadd.f32 %v369_v38, %v215_v41  ;;  %v435_v43 = vpop.f32.mrb[2].mxu1 }
 0x1ba   :  { %v227_v44 = vadd.f32 %v435_v43, %v369_v38  ;;  %v218_v45 = vpop.f32.mrb[3].mxu1  ;;  %v232_v47 = vmax.f32 %v224_v40, 0.0 }
 0x1bb   :  { %v219_v46 = vadd.f32 %v369_v38, %v218_v45  ;;  %v230_v49 = vmax.f32 %v216_v42, 0.0 }
 0x1bc   :  { %v233_v48 = vmax.f32 %v227_v44, 0.0 }
 0x1bd   :  { %v231_v50 = vmax.f32 %v219_v46, 0.0 }
 0x1be   :  { %v235_v51 = vpack.c.bf16 %v233_v48, %v232_v47 }
 0x1bf   :  { %v234_v52 = vpack.c.bf16 %v231_v50, %v230_v49 }
 0x1c1   :  { %452 = vmatprep.mubr.bf16.mxu0 %v234_v52 }
 0x1c2   :  { %453 = vmatmul.mubr.bf16.vlgmr.msra.gmra.mrb[4].mxu0 %v235_v51 }
 0x295   :  { %v454_v54 = vpop.f32.mrb[4].mxu0 }
 0x296   :  { %v350_v55 = vadd.f32 %v454_v54, %v378_v53  ;;  %v341_v56 = vpop.f32.mrb[5].mxu0 }
 0x297   :  { %v342_v57 = vadd.f32 %v378_v53, %v341_v56  ;;  %v455_v58 = vpop.f32.mrb[6].mxu0 }
 0x298   :  { %359 = vst.msk [vmem:[%s604_s7 + $0x10] sm:$0xff] %vm356_vm1, %v350_v55  ;;  %v353_v59 = vadd.f32 %v455_v58, %v378_v53  ;;  %v344_v60 = vpop.f32.mrb[7].mxu0 }
 0x299   :  { %357 = vst.msk [vmem:[%s604_s7] sm:$0xff] %vm356_vm1, %v342_v57  ;;  %v345_v61 = vadd.f32 %v378_v53, %v344_v60 }
 0x29a   :  { %360 = vst.msk [vmem:[%s604_s7 + $0x18] sm:$0xff] %vm356_vm1, %v353_v59 }
 0x29b   :  { %358 = vst.msk [vmem:[%s604_s7 + $0x8] sm:$0xff] %vm356_vm1, %v345_v61 }

</bundles_post_ra>
